<compile_context>
chip_gen: v7x
topology: tpu7x:2x2x1
jax: 0.10.0
libtpu: 0.0.40
codegen_flags: <defaults>
</compile_context>

<pallas_src>
import jax
import jax.numpy as jnp
from jax.experimental import pallas as pl
from jax.experimental.pallas import tpu as pltpu


def _group_all_concat_kernel(xyz_ref, feat_ref, out_ref):
    # xyz_ref : (1, 3,     TN)   -- transpose already hoisted to the wrapper
    # feat_ref: (1, C,     TN)
    # out_ref : (1, C + 3, TN)
    out_ref[0, 0:3, :] = xyz_ref[0].astype(out_ref.dtype)
    # Feature rows land at channel offset 3 of the concatenated output; the sublane
    # shift is inherent to the output layout (torch.cat along channels) and Mosaic
    # performs it in-register before a full-lane-width store.
    out_ref[0, 3:, :] = feat_ref[0].astype(out_ref.dtype)


def _choose_point_tile(N, C, itemsize):
    """Lane-axis tile (multiple of 128, or full N) keeping double-buffered
    input+output blocks comfortably inside v5e's 16 MiB default scoped VMEM."""
    budget = 12 * 1024 * 1024                      # leave headroom under 16 MiB
    bytes_per_lane = (2 * C + 32) * itemsize       # feat + out + padded xyz rows
    tn = budget // (2 * bytes_per_lane)            # x2 for double buffering
    tn = (tn // 128) * 128
    if tn <= 0:
        # TODO(synk): channel-tile for pathologically large C (>~6k); GroupAll in
        # PointNet++ never reaches this regime.
        tn = 128
    return N if tn >= N else tn


def group_all(xyz, new_xyz=None, features=None, use_xyz=True, point_tile=None):
    """Pallas implementation of GroupAll.forward.

    xyz:      (B, N, 3)
    new_xyz:  ignored (signature parity with the PyTorch module)
    features: (B, C, N) or None
    returns:  (B, C+3, 1, N) / (B, C, 1, N) / (B, 3, 1, N)  (see module spec)
    """
    del new_xyz
    B, N, _ = xyz.shape

    if features is None:
        # Pure layout op (transpose + unsqueeze): no copy kernel needed.
        return jnp.transpose(xyz, (0, 2, 1))[:, :, None, :]

    C = features.shape[1]
    if not use_xyz:
        # Identity in memory: just add the singleton nsample axis (free reshape).
        return features[:, :, None, :]

    # NOTE: torch.cat would raise on mismatched dtypes; here we promote instead.
    out_dtype = jnp.result_type(xyz.dtype, features.dtype)

    # Hoisted transpose: present xyz lane-dense as (B, 3, N).
    xyz_t = jnp.transpose(xyz, (0, 2, 1))

    tn = point_tile if point_tile is not None else _choose_point_tile(
        N, C, jnp.dtype(out_dtype).itemsize)
    grid = (B, pl.cdiv(N, tn))

    out2d = pl.pallas_call(
        _group_all_concat_kernel,
        out_shape=jax.ShapeDtypeStruct((B, C + 3, N), out_dtype),
        grid=grid,
        in_specs=[
            pl.BlockSpec((1, 3, tn), lambda b, j: (b, 0, j)),
            pl.BlockSpec((1, C, tn), lambda b, j: (b, 0, j)),
        ],
        out_specs=pl.BlockSpec((1, C + 3, tn), lambda b, j: (b, 0, j)),
        compiler_params=pltpu.CompilerParams(
            dimension_semantics=("parallel", "parallel")),
    )(xyz_t, features)

    # Trailing singleton "nsample" axis is a free metadata reshape.
    return out2d.reshape(B, C + 3, 1, N)


if __name__ == "__main__":
    key = jax.random.PRNGKey(0)
    kx, kf = jax.random.split(key)

    # Small shapes consistent with the module.
    B, N, C = 2, 16, 4
    xyz = jax.random.normal(kx, (B, N, 3), dtype=jnp.float32)        # (B, N, 3)
    features = jax.random.normal(kf, (B, C, N), dtype=jnp.float32)   # (B, C, N)

    out = jax.block_until_ready(group_all(xyz, None, features, use_xyz=True))

    grouped_xyz = jnp.transpose(xyz, (0, 2, 1))[:, :, None, :]       # (B, 3, 1, N)
    ref = jnp.concatenate([grouped_xyz, features[:, :, None, :]], axis=1)
    assert out.shape == (B, C + 3, 1, N), out.shape
    assert jnp.allclose(out, ref), "mismatch vs reference (xyz+features path)"

    # Exercise the lane-tiled, multi-grid-point path.
    B2, N2, C2 = 2, 384, 6
    kx2, kf2 = jax.random.split(kf)
    xyz2 = jax.random.normal(kx2, (B2, N2, 3), dtype=jnp.float32)
    feat2 = jax.random.normal(kf2, (B2, C2, N2), dtype=jnp.float32)
    out2 = jax.block_until_ready(
        group_all(xyz2, None, feat2, use_xyz=True, point_tile=128))
    ref2 = jnp.concatenate(
        [jnp.transpose(xyz2, (0, 2, 1))[:, :, None, :], feat2[:, :, None, :]], axis=1)
    assert out2.shape == (B2, C2 + 3, 1, N2), out2.shape
    assert jnp.allclose(out2, ref2), "mismatch vs reference (tiled path)"

    # Pure-layout branches (no kernel by design, per perf review).
    out_xyz_only = jax.block_until_ready(group_all(xyz, None, None))
    assert out_xyz_only.shape == (B, 3, 1, N)
    assert jnp.allclose(out_xyz_only, grouped_xyz)

    out_feat_only = jax.block_until_ready(group_all(xyz, None, features, use_xyz=False))
    assert out_feat_only.shape == (B, C, 1, N)
    assert jnp.allclose(out_feat_only, features[:, :, None, :])

    print("KERNEL_OK")
</pallas_src>

<mosaic_0001>
module attributes {stable_mosaic.version = 11 : i64} {
  func.func @_group_all_concat_kernel(%arg0: i32, %arg1: i32, %arg2: memref<1x3x16xf32, #tpu.memory_space<vmem>>, %arg3: memref<1x4x16xf32, #tpu.memory_space<vmem>>, %arg4: memref<1x7x16xf32, #tpu.memory_space<vmem>>) attributes {dimension_semantics = [#tpu.dimension_semantics<parallel>, #tpu.dimension_semantics<parallel>], iteration_bounds = array<i64: 2, 1>, scalar_prefetch = 0 : i64, scratch_operands = 0 : i64, tpu.core_type = #tpu.core_type<tc>, window_params = [{transform_indices = @transform_0, window_bounds = array<i64: 1, 3, 16>}, {transform_indices = @transform_1, window_bounds = array<i64: 1, 4, 16>}, {transform_indices = @transform_2, window_bounds = array<i64: 1, 7, 16>}]} {
    %c0 = arith.constant 0 : index
    %c0_0 = arith.constant 0 : index
    %c0_1 = arith.constant 0 : index
    %0 = vector.load %arg2[%c0, %c0_0, %c0_1] : memref<1x3x16xf32, #tpu.memory_space<vmem>>, vector<1x3x16xf32>
    %1 = vector.shape_cast %0 : vector<1x3x16xf32> to vector<3x16xf32>
    %c0_2 = arith.constant 0 : index
    %c0_3 = arith.constant 0 : index
    %c0_4 = arith.constant 0 : index
    %2 = vector.load %arg4[%c0_2, %c0_3, %c0_4] : memref<1x7x16xf32, #tpu.memory_space<vmem>>, vector<1x3x16xf32>
    %3 = vector.shape_cast %2 : vector<1x3x16xf32> to vector<3x16xf32>
    %4 = vector.shape_cast %1 : vector<3x16xf32> to vector<1x3x16xf32>
    tpu.vector_store %arg4[%c0_2, %c0_3, %c0_4], %4 {strides = array<i32>} : memref<1x7x16xf32, #tpu.memory_space<vmem>>, vector<1x3x16xf32>,
    %c0_5 = arith.constant 0 : index
    %c0_6 = arith.constant 0 : index
    %c0_7 = arith.constant 0 : index
    %5 = vector.load %arg3[%c0_5, %c0_6, %c0_7] : memref<1x4x16xf32, #tpu.memory_space<vmem>>, vector<1x4x16xf32>
    %6 = vector.shape_cast %5 : vector<1x4x16xf32> to vector<4x16xf32>
    %c0_8 = arith.constant 0 : index
    %c3 = arith.constant 3 : index
    %c0_9 = arith.constant 0 : index
    %7 = vector.load %arg4[%c0_8, %c3, %c0_9] : memref<1x7x16xf32, #tpu.memory_space<vmem>>, vector<1x4x16xf32>
    %8 = vector.shape_cast %7 : vector<1x4x16xf32> to vector<4x16xf32>
    %9 = vector.shape_cast %6 : vector<4x16xf32> to vector<1x4x16xf32>
    tpu.vector_store %arg4[%c0_8, %c3, %c0_9], %9 {strides = array<i32>} : memref<1x7x16xf32, #tpu.memory_space<vmem>>, vector<1x4x16xf32>,
    return
  }
  func.func @transform_0(%arg0: i32, %arg1: i32) -> (i32, i32, i32) {
    %c0_i32 = arith.constant 0 : i32
    %c0_i32_0 = arith.constant 0 : i32
    return %arg0, %c0_i32, %arg1 : i32, i32, i32
  }
  func.func @transform_1(%arg0: i32, %arg1: i32) -> (i32, i32, i32) {
    %c0_i32 = arith.constant 0 : i32
    %c0_i32_0 = arith.constant 0 : i32
    return %arg0, %c0_i32, %arg1 : i32, i32, i32
  }
  func.func @transform_2(%arg0: i32, %arg1: i32) -> (i32, i32, i32) {
    %c0_i32 = arith.constant 0 : i32
    %c0_i32_0 = arith.constant 0 : i32
    return %arg0, %c0_i32, %arg1 : i32, i32, i32
  }
}

</mosaic_0001>

<bundles_post_ra>
// kernel: tpu_custom_call.1
= control target key start
LH: loop header
LB: loop body
LE: loop exit
PB: predicated region body
PF: predicated region fallthrough
CT: control target
= control target key end

     0   :  { %s366_s9 = smov 0   ;;  %s368_s10 = smov 0   ;;  %s390_s0 = inlined_call_operand.vmem [shape: f32[2,3,16], index: 0, kind: input, shape index: {}]   ;;  %s391_s1 = inlined_call_operand.vmem [shape: f32[2,4,16], index: 1, kind: input, shape index: {}]   ;;  %s392_s2 = inlined_call_operand.vmem [shape: f32[2,7,16], index: 2, kind: output, shape index: {}]  }
   0x1   :  { %s370_s11 = smov 0  }
   0x2 LB: > { %s24_s12 = sadd.s32 1, %s345_s10  ;;  %p297_p0 = scmp.ge.s32.totalorder %s349_s11, 1  ;;  %s349_s11 = sphi %s370_s11, %s12_s11   ;;  %s345_s10 = sphi %s368_s10, %s394_s10   ;;  %s341_s9 = sphi %s366_s9, %s393_s9  }
   0x3   : > { %p26_p1 = scmp.ge.s32.totalorder %s24_s12, 2  ;;  %p144_p2 = scmp.lt.s32.totalorder %s349_s11, 3 }
   0x5   : > { %s396_s12 = smov (%p26_p1, %s24_s12), 0  ;;  %p145_p3 = pnand %p297_p0, %p144_p2 }
   0x6   : > { %p177_p4 = scmp.lt.s32.totalorder (!%p145_p3), %s341_s9, 1  ;;  %vm199_vm0 = vcmask (!%p145_p3), 124928   ;;  %vm202_vm1 = vcmask (!%p145_p3), 125952  }
   0x7   : > { %148 = sbr.rel (%p145_p3) target bundleno = 20 (0x14), region = 28 }
   0xe   : > { %s398_s9 = smov (!%p177_p4, %s341_s9), 1 }
   0xf   : > { %s298_s13 = sshll.u32 %s398_s9, 2  ;;  %s300_s14 = sshll.u32 %s398_s9, 3 }
  0x10   : > { %s183_s17 = scalar_lea.vmem %s390_s0, %s298_s13  ;;  %s197_s20 = scalar_lea.vmem %s392_s2, %s300_s14 }
  0x11   : > { %v198_v0 = vld [vmem:[%s183_s17] sm:$0x7]  ;;  %s190_s23 = scalar_lea.vmem %s391_s1, %s298_s13 }
  0x12   : > { %200 = vst.msk [vmem:[%s197_s20] sm:$0x7] %vm199_vm0, %v198_v0  ;;  %v201_v1 = vld [vmem:[%s190_s23] sm:$0xf] }
  0x13   : > { %203 = vst.msk [vmem:[%s197_s20 + $0x3] sm:$0xf] %vm202_vm1, %v201_v1 }
  0x14 PF: > { %s12_s11 = sadd.s32 1, %s349_s11   ;;  %s393_s9 = smov %s345_s10 }
  0x15   : > { %p9_p5 = scmp.ge.s32.totalorder %s12_s11, 4   ;;  %s394_s10 = smov %s396_s12 }
  0x17   :  { %11 = sbr.rel (!%p9_p5) target bundleno = 2 (0x2), region = 61 }

</bundles_post_ra>
